<compile_context>
chip_gen: v6e
topology: v6e:2x2x1
jax: 0.10.0
libtpu: 0.0.40
codegen_flags: <defaults>
</compile_context>

<pallas_src>
import functools
import math

import jax
import jax.numpy as jnp
from jax.experimental import pallas as pl
from jax.experimental.pallas import tpu as pltpu


def _meta_learner_kernel(x_ref, ww_ref, bw_ref, wb_ref, bb_ref, ow_ref, ob_ref):
    # x_ref : [TM, C]   row tile of flattened meta knowledge
    # ww_ref: [C, Nw]   meta_W weight (VMEM-resident across the grid)
    # bw_ref: [1, Nw]   meta_W bias
    # wb_ref: [C, Nb]   meta_b weight
    # bb_ref: [1, Nb]   meta_b bias
    # ow_ref: [TM, Nw]  meta_W output tile
    # ob_ref: [TM, Nb]  meta_b output tile
    x = x_ref[...]  # load the input tile once, reuse for both linears

    yw = jnp.dot(x, ww_ref[...], preferred_element_type=jnp.float32)
    yw = yw + bw_ref[...]  # broadcast [1, Nw] over rows (once per tile)
    ow_ref[...] = yw.astype(ow_ref.dtype)

    yb = jnp.dot(x, wb_ref[...], preferred_element_type=jnp.float32)
    yb = yb + bb_ref[...]
    ob_ref[...] = yb.astype(ob_ref.dtype)


def _fused_meta_linear(x2d, ww, bw, wb, bb, tile_m):
    """x2d: [M, C] f32 -> (yw: [M, Nw], yb: [M, Nb])."""
    M, C = x2d.shape
    Nw = ww.shape[1]
    Nb = wb.shape[1]

    # Tile rows: multiple of 8 (sublane), capped at tile_m; pad M to the grid.
    tm = min(tile_m, max(8, ((M + 7) // 8) * 8))
    grid_m = pl.cdiv(M, tm)
    m_pad = grid_m * tm
    if m_pad != M:
        x2d = jnp.pad(x2d, ((0, m_pad - M), (0, 0)))

    yw, yb = pl.pallas_call(
        _meta_learner_kernel,
        out_shape=(
            jax.ShapeDtypeStruct((m_pad, Nw), x2d.dtype),
            jax.ShapeDtypeStruct((m_pad, Nb), x2d.dtype),
        ),
        grid_spec=pltpu.PrefetchScalarGridSpec(
            num_scalar_prefetch=0,
            grid=(grid_m,),
            in_specs=[
                pl.BlockSpec((tm, C), lambda i: (i, 0)),    # x row tile
                pl.BlockSpec((C, Nw), lambda i: (0, 0)),    # meta_W weight
                pl.BlockSpec((1, Nw), lambda i: (0, 0)),    # meta_W bias
                pl.BlockSpec((C, Nb), lambda i: (0, 0)),    # meta_b weight
                pl.BlockSpec((1, Nb), lambda i: (0, 0)),    # meta_b bias
            ],
            out_specs=[
                pl.BlockSpec((tm, Nw), lambda i: (i, 0)),
                pl.BlockSpec((tm, Nb), lambda i: (i, 0)),
            ],
        ),
        compiler_params=pltpu.CompilerParams(
            dimension_semantics=("parallel",),  # row blocks independent -> 2 TCs on v7x
        ),
    )(x2d, ww, bw.reshape(1, Nw), wb, bb.reshape(1, Nb))

    return yw[:M], yb[:M]


@functools.partial(jax.jit, static_argnames=("w_in", "w_out", "tile_m"))
def meta_learner_forward(meta_knowledge, params, *, w_in, w_out, tile_m=1024):
    """meta_knowledge: [..., meta_in_c] -> (meta_W [..., W_in, W_out], meta_b [..., W_out])."""
    ww, bw, wb, bb = params
    lead = meta_knowledge.shape[:-1]
    c = meta_knowledge.shape[-1]
    m = math.prod(lead) if lead else 1
    x2d = meta_knowledge.reshape(m, c)

    yw, yb = _fused_meta_linear(x2d, ww, bw, wb, bb, tile_m)

    meta_w = yw.reshape(*lead, w_in, w_out)
    meta_b = yb.reshape(*lead, w_out)
    return meta_w, meta_b


def init_meta_learner_params(key, meta_in_c, w_in, w_out):
    """Deterministic init matching torch.nn.Linear defaults (weights stored [in, out])."""
    nw = w_in * w_out
    k1, k2, k3, k4 = jax.random.split(key, 4)
    bound = 1.0 / math.sqrt(meta_in_c)
    ww = jax.random.uniform(k1, (meta_in_c, nw), jnp.float32, -bound, bound)
    bw = jax.random.uniform(k2, (nw,), jnp.float32, -bound, bound)
    wb = jax.random.uniform(k3, (meta_in_c, w_out), jnp.float32, -bound, bound)
    bb = jax.random.uniform(k4, (w_out,), jnp.float32, -bound, bound)
    return ww, bw, wb, bb


def _reference_forward(meta_knowledge, params, w_in, w_out):
    """Pure-JAX reference of MetaLearner for a sanity check."""
    ww, bw, wb, bb = params
    lead = meta_knowledge.shape[:-1]
    yw = meta_knowledge @ ww + bw
    yb = meta_knowledge @ wb + bb
    return yw.reshape(*lead, w_in, w_out), yb.reshape(*lead, w_out)


if __name__ == "__main__":
    meta_in_c, w_in, w_out = 4, 8, 16
    B, X = 2, 8

    key = jax.random.PRNGKey(0)
    key, kx = jax.random.split(key)
    params = init_meta_learner_params(key, meta_in_c, w_in, w_out)

    # 3-D case: [B, X, meta_in_c]
    mk3 = jax.random.normal(kx, (B, X, meta_in_c), jnp.float32)
    w3, b3 = meta_learner_forward(mk3, params, w_in=w_in, w_out=w_out)
    w3, b3 = jax.block_until_ready((w3, b3))
    rw3, rb3 = _reference_forward(mk3, params, w_in, w_out)
    assert w3.shape == (B, X, w_in, w_out), w3.shape
    assert b3.shape == (B, X, w_out), b3.shape
    assert jnp.allclose(w3, rw3, atol=1e-5, rtol=1e-5), "meta_W mismatch (3D)"
    assert jnp.allclose(b3, rb3, atol=1e-5, rtol=1e-5), "meta_b mismatch (3D)"

    # 2-D case: [X, meta_in_c]
    mk2 = mk3[0]
    w2, b2 = meta_learner_forward(mk2, params, w_in=w_in, w_out=w_out)
    w2, b2 = jax.block_until_ready((w2, b2))
    rw2, rb2 = _reference_forward(mk2, params, w_in, w_out)
    assert w2.shape == (X, w_in, w_out), w2.shape
    assert b2.shape == (X, w_out), b2.shape
    assert jnp.allclose(w2, rw2, atol=1e-5, rtol=1e-5), "meta_W mismatch (2D)"
    assert jnp.allclose(b2, rb2, atol=1e-5, rtol=1e-5), "meta_b mismatch (2D)"

    print("KERNEL_OK")
</pallas_src>

<mosaic_0001>
module attributes {stable_mosaic.version = 11 : i64} {
  func.func @_meta_learner_kernel(%arg0: i32, %arg1: memref<16x4xf32, #tpu.memory_space<vmem>>, %arg2: memref<4x128xf32, #tpu.memory_space<vmem>>, %arg3: memref<1x128xf32, #tpu.memory_space<vmem>>, %arg4: memref<4x16xf32, #tpu.memory_space<vmem>>, %arg5: memref<1x16xf32, #tpu.memory_space<vmem>>, %arg6: memref<16x128xf32, #tpu.memory_space<vmem>>, %arg7: memref<16x16xf32, #tpu.memory_space<vmem>>) attributes {dimension_semantics = [#tpu.dimension_semantics<parallel>], iteration_bounds = array<i64: 1>, scalar_prefetch = 0 : i64, scratch_operands = 0 : i64, tpu.core_type = #tpu.core_type<tc>, window_params = [{transform_indices = @transform_0, window_bounds = array<i64: 16, 4>}, {pipeline_mode = #tpu.pipeline_mode<synchronous>, transform_indices = @transform_1, window_bounds = array<i64: 4, 128>}, {pipeline_mode = #tpu.pipeline_mode<synchronous>, transform_indices = @transform_2, window_bounds = array<i64: 1, 128>}, {pipeline_mode = #tpu.pipeline_mode<synchronous>, transform_indices = @transform_3, window_bounds = array<i64: 4, 16>}, {pipeline_mode = #tpu.pipeline_mode<synchronous>, transform_indices = @transform_4, window_bounds = array<i64: 1, 16>}, {transform_indices = @transform_5, window_bounds = array<i64: 16, 128>}, {transform_indices = @transform_6, window_bounds = array<i64: 16, 16>}]} {
    %c0 = arith.constant 0 : index
    %c0_0 = arith.constant 0 : index
    %0 = vector.load %arg1[%c0, %c0_0] : memref<16x4xf32, #tpu.memory_space<vmem>>, vector<16x4xf32>
    %c0_1 = arith.constant 0 : index
    %c0_2 = arith.constant 0 : index
    %1 = vector.load %arg2[%c0_1, %c0_2] : memref<4x128xf32, #tpu.memory_space<vmem>>, vector<4x128xf32>
    %cst = arith.constant dense<0.000000e+00> : vector<16x128xf32>
    %2 = tpu.matmul %0, %1, %cst {dimension_numbers = #tpu.dot_dimension_numbers<[1], [0], [0], [1], [0, 0, 1, 1], [], []>} : vector<16x4xf32>, vector<4x128xf32>, vector<16x128xf32> -> vector<16x128xf32>
    %c0_3 = arith.constant 0 : index
    %c0_4 = arith.constant 0 : index
    %3 = vector.load %arg3[%c0_3, %c0_4] : memref<1x128xf32, #tpu.memory_space<vmem>>, vector<1x128xf32>
    %4 = vector.broadcast %3 : vector<1x128xf32> to vector<16x128xf32>
    %5 = arith.addf %2, %4 : vector<16x128xf32>
    %c0_5 = arith.constant 0 : index
    %c0_6 = arith.constant 0 : index
    %6 = vector.load %arg6[%c0_5, %c0_6] : memref<16x128xf32, #tpu.memory_space<vmem>>, vector<16x128xf32>
    tpu.vector_store %arg6[%c0_5, %c0_6], %5 {strides = array<i32>} : memref<16x128xf32, #tpu.memory_space<vmem>>, vector<16x128xf32>,
    %c0_7 = arith.constant 0 : index
    %c0_8 = arith.constant 0 : index
    %7 = vector.load %arg4[%c0_7, %c0_8] : memref<4x16xf32, #tpu.memory_space<vmem>>, vector<4x16xf32>
    %cst_9 = arith.constant dense<0.000000e+00> : vector<16x16xf32>
    %8 = tpu.matmul %0, %7, %cst_9 {dimension_numbers = #tpu.dot_dimension_numbers<[1], [0], [0], [1], [0, 0, 1, 1], [], []>} : vector<16x4xf32>, vector<4x16xf32>, vector<16x16xf32> -> vector<16x16xf32>
    %c0_10 = arith.constant 0 : index
    %c0_11 = arith.constant 0 : index
    %9 = vector.load %arg5[%c0_10, %c0_11] : memref<1x16xf32, #tpu.memory_space<vmem>>, vector<1x16xf32>
    %10 = vector.broadcast %9 : vector<1x16xf32> to vector<16x16xf32>
    %11 = arith.addf %8, %10 : vector<16x16xf32>
    %c0_12 = arith.constant 0 : index
    %c0_13 = arith.constant 0 : index
    %12 = vector.load %arg7[%c0_12, %c0_13] : memref<16x16xf32, #tpu.memory_space<vmem>>, vector<16x16xf32>
    tpu.vector_store %arg7[%c0_12, %c0_13], %11 {strides = array<i32>} : memref<16x16xf32, #tpu.memory_space<vmem>>, vector<16x16xf32>,
    return
  }
  func.func @transform_0(%arg0: i32) -> (i32, i32) {
    %c0_i32 = arith.constant 0 : i32
    %c0_i32_0 = arith.constant 0 : i32
    return %arg0, %c0_i32 : i32, i32
  }
  func.func @transform_1(%arg0: i32) -> (i32, i32) {
    %c0_i32 = arith.constant 0 : i32
    %c0_i32_0 = arith.constant 0 : i32
    %c0_i32_1 = arith.constant 0 : i32
    return %c0_i32, %c0_i32_0 : i32, i32
  }
  func.func @transform_2(%arg0: i32) -> (i32, i32) {
    %c0_i32 = arith.constant 0 : i32
    %c0_i32_0 = arith.constant 0 : i32
    %c0_i32_1 = arith.constant 0 : i32
    return %c0_i32, %c0_i32_0 : i32, i32
  }
  func.func @transform_3(%arg0: i32) -> (i32, i32) {
    %c0_i32 = arith.constant 0 : i32
    %c0_i32_0 = arith.constant 0 : i32
    %c0_i32_1 = arith.constant 0 : i32
    return %c0_i32, %c0_i32_0 : i32, i32
  }
  func.func @transform_4(%arg0: i32) -> (i32, i32) {
    %c0_i32 = arith.constant 0 : i32
    %c0_i32_0 = arith.constant 0 : i32
    %c0_i32_1 = arith.constant 0 : i32
    return %c0_i32, %c0_i32_0 : i32, i32
  }
  func.func @transform_5(%arg0: i32) -> (i32, i32) {
    %c0_i32 = arith.constant 0 : i32
    %c0_i32_0 = arith.constant 0 : i32
    return %arg0, %c0_i32 : i32, i32
  }
  func.func @transform_6(%arg0: i32) -> (i32, i32) {
    %c0_i32 = arith.constant 0 : i32
    %c0_i32_0 = arith.constant 0 : i32
    return %arg0, %c0_i32 : i32, i32
  }
}

</mosaic_0001>

<bundles_post_ra>
// kernel: meta_learner_forward.1
= control target key start
LH: loop header
LB: loop body
LE: loop exit
PB: predicated region body
PF: predicated region fallthrough
CT: control target
= control target key end

     0   :  { %vm40_vm0 = vcmask 1043456   ;;  %vm33_vm1 = vcmask 31744   ;;  %s344_s0 = inlined_call_operand.vmem [shape: f32[16,4], index: 0, kind: input, shape index: {}]   ;;  %s345_s1 = inlined_call_operand.vmem [shape: f32[4,128], index: 1, kind: input, shape index: {}]   ;;  %s346_s2 = inlined_call_operand.vmem [shape: f32[1,128], index: 2, kind: input, shape index: {}]   ;;  %s347_s3 = inlined_call_operand.vmem [shape: f32[4,16], index: 3, kind: input, shape index: {}]   ;;  %s348_s4 = inlined_call_operand.vmem [shape: f32[1,16], index: 4, kind: input, shape index: {}]   ;;  %s349_s5 = inlined_call_operand.vmem [shape: f32[16,128], index: 5, kind: output, shape index: {0}]   ;;  %s350_s6 = inlined_call_operand.hbm [shape: f32[16,16], index: 6, kind: output, shape index: {1}]  }
   0x1   :  { %v25_v0 = vld [vmem:[%s345_s1] sm:$0xf]  ;;  %v24_v3 = vld [vmem:[%s344_s0 + $0x8] sm:$0xff] }
   0x2   :  { %v121_v1 = vld [vmem:[%s347_s3] sm:$0xf]  ;;  %244 = vmatprep.subr.msk.mxu0 %vm40_vm0, %v25_v0 }
   0x3   :  { %v23_v2 = vld [vmem:[%s344_s0] sm:$0xff]  ;;  %249 = vmatprep.subr.msk.mxu1 %vm40_vm0, %v121_v1 }
   0x4   :  { %12 = vsyncpa [#allocation3], 0  ;;  %245 = vmatpush3.msk.msra.mxu0 %vm40_vm0, %v25_v0  ;;  %246 = vmatprep.mubr.msk.f32.mxu0 %vm33_vm1, %v23_v2  ;;  %v230_v4 = vld [vmem:[%s346_s2] ss:$0 sm:$0xff]  ;;  %s279_s7 = smov [#allocation2]   ;;  %vm207_vm2 = vcmask 130048  }
   0x5   :  { %250 = vmatpush3.msk.msra.mxu1 %vm40_vm0, %v121_v1  ;;  %251 = vmatprep.mubr.msk.f32.mxu1 %vm33_vm1, %v23_v2  ;;  %v234_v5 = vld [vmem:[%s348_s4] ss:$0 sm:$0xff]  ;;  %s217_s8 = sshll.u32 %s279_s7, 4  ;;  %s218_s8 = int_to_ptr.vmem [resolvable:$true] %s217_s8 }
   0x6   :  { %247 = vmatmul.mubr.msk.f32.vlgmr.msra.gmra.mxu0 %vm33_vm1, %v24_v3  ;;  %252 = vmatmul.mubr.msk.f32.vlgmr.msra.gmra.mxu1 %vm33_vm1, %v24_v3  ;;  %s257_s4 = scalar_lea.vmem %s218_s8, 256  ;;  %p262_p1 = scmp.lt.s32.totalorder %s218_s8, %s218_s8 }
   0x7   :  { %p258_p0 = scmp.ne.s32.totalorder %s218_s8, %s257_s4  ;;  %p263_p2 = scmp.lt.s32.totalorder %s257_s4, %s257_s4 }
   0x9   :  { %p264_p3 = por %p263_p2, %p262_p1 }
   0xb   :  { %p265_p4 = pnand %p264_p3, %p258_p0 }
  0xc6   :  { %v248_v6 = vpop.f32.mrf.mxu0  ;;  %v253_v7 = vpop.f32.mrf.mxu1 }
  0xc7   :  { %v116_v8 = vadd.f32 %v248_v6, %v230_v4  ;;  %v204_v9 = vadd.f32 %v253_v7, %v234_v5 }
  0xc8   :  { %v110_v10 = vpop.f32.mrf.mxu0  ;;  %v198_v11 = vpop.f32.mrf.mxu1 }
  0xc9   :  { %120 = vst [vmem:[%s349_s5 + $0x8] sm:$0xff] %v116_v8  ;;  %209 = vst.msk [vmem:[#allocation2 + $0x8] sm:$0xff] %vm207_vm2, %v204_v9  ;;  %v111_v12 = vadd.f32 %v230_v4, %v110_v10  ;;  %v199_v13 = vadd.f32 %v234_v5, %v198_v11 }
  0xcb   :  { %119 = vst [vmem:[%s349_s5] sm:$0xff] %v111_v12  ;;  %208 = vst.msk [vmem:[#allocation2] sm:$0xff] %vm207_vm2, %v199_v13 }
  0xcc   :  { %268 = shalt.err (!%p265_p4)
}
  0xcd   :  { %s280_s11 = smov 128   ;;  %s281_s12 = smov 8  }
  0xce   :  { %223 = dma.vmem_to_hbm [thread:$0]  %s218_s8, 256, %s350_s6, [#allocation3], %s280_s11, %s280_s11, %s281_s12  }
  0xcf   :  { %277 = dma.done.wait [#allocation3], 256  }
  0xd0   :  { %278 = vsyncadd [#allocation3], 4294967040 }
  0xd1   :  { %229 = vsyncpa [#allocation3], 1 }

</bundles_post_ra>
